<compile_context>
chip_gen: v6e
topology: v6e:2x2x1
jax: 0.10.0
libtpu: 0.0.40
codegen_flags: <defaults>
</compile_context>

<pallas_src>
import functools
import math

import jax
import jax.numpy as jnp
from jax.experimental import pallas as pl
from jax.experimental.pallas import tpu as pltpu

_LANE = 128
_DEFAULT_SCOPED_VMEM = 32 * 1024 * 1024   # conservative default scoped limit
_MAX_VMEM_LIMIT = 64 * 1024 * 1024        # v7x physical VMEM per TensorCore


def _round_up(n, m):
    return ((n + m - 1) // m) * m


def _pad_last(a, target):
    pad = target - a.shape[-1]
    if pad == 0:
        return a
    widths = [(0, 0)] * (a.ndim - 1) + [(0, pad)]
    return jnp.pad(a, widths)


def _pad_2d(w, rows, cols):
    pr, pc = rows - w.shape[0], cols - w.shape[1]
    if pr == 0 and pc == 0:
        return w
    return jnp.pad(w, ((0, pr), (0, pc)))


def _mlp_fused_kernel(*refs, depth: int, eps: float, emit_all: bool):
    """Whole-MLP fused kernel (single shot, no grid).

    refs layout:
      refs[0]                      : x        [N, D0_pad]            f32
      refs[1 + 4*i .. 1 + 4*i + 3] : gamma_i  [1, Di_pad]            f32
                                     beta_i   [1, Di_pad]            f32
                                     W_i      [Di_pad, D(i+1)_pad]   bf16
                                     b_i      [1, D(i+1)_pad]        f32
      refs[1 + 4*depth ..]         : outputs (depth of them if emit_all,
                                     else just the final one)
    """
    x_ref = refs[0]
    param_refs = refs[1:1 + 4 * depth]
    out_refs = refs[1 + 4 * depth:]

    x = x_ref[...].astype(jnp.float32)
    for i in range(depth):  # static unroll at trace time
        g_ref, be_ref, w_ref, b_ref = param_refs[4 * i:4 * i + 4]

        # BatchNorm1d, training mode: per-feature batch mean and *biased*
        # batch variance, then affine.  var = E[x^2] - mean^2 (clamped so a
        # cancellation residue can't make rsqrt see a negative) saves one full
        # (N, D) elementwise op vs the `centered` formulation.  Padded lanes
        # are exactly 0 (gamma/beta pad = 0 => scale = shift = 0 there), so
        # zeros propagate exactly through matmul (W/b pad = 0) and ReLU.
        mean = jnp.mean(x, axis=0, keepdims=True)
        msq = jnp.mean(x * x, axis=0, keepdims=True)
        var = jnp.maximum(msq - mean * mean, 0.0)
        scale = g_ref[...] * jax.lax.rsqrt(var + eps)   # gamma folded in
        shift = be_ref[...] - mean * scale              # beta folded in
        x_norm = x * scale + shift

        # Linear on the MXU: bf16 operands, f32 accumulation.
        y = jnp.dot(x_norm.astype(w_ref.dtype), w_ref[...],
                    preferred_element_type=jnp.float32)
        y = y + b_ref[...]

        if i < depth - 1:
            y = jnp.maximum(y, 0.0)  # ReLU on all but the final layer

        if emit_all:
            out_refs[i][...] = y.astype(out_refs[i].dtype)
        elif i == depth - 1:
            out_refs[0][...] = y.astype(out_refs[0].dtype)
        x = y  # intermediate stays on-chip; feeds the next layer directly


def make_mlp_forward(width_list, *, eps: float = 1e-5,
                     return_intermediates: bool = True,
                     slice_outputs: bool = True):
    """Builds a jitted forward fn(flat_padded_params, x) for fixed widths.

    return_intermediates=True reproduces MLP.forward's out_list
    ([x, h1, ..., out]); False emits only the final activation from the kernel
    (no per-layer HBM writebacks).  slice_outputs=False returns lane-padded
    (x128) arrays and skips the post-kernel narrowing copies.
    """
    depth = len(width_list) - 1
    widths = list(width_list)
    padded = [_round_up(d, _LANE) for d in widths]

    def fwd(flat_params, x):
        n, d0 = x.shape
        assert d0 == widths[0], (d0, widths[0])

        # Lane-dense input; this pad fuses into the surrounding jit.
        x_p = _pad_last(x, padded[0])
        inputs = (x_p,) + tuple(flat_params)

        # Whole-array, VMEM-resident operands (no grid).
        in_specs = [pl.BlockSpec(memory_space=pltpu.MemorySpace.VMEM)
                    for _ in inputs]
        out_dims = padded[1:] if return_intermediates else [padded[-1]]
        out_shape = tuple(jax.ShapeDtypeStruct((n, d), x.dtype)
                          for d in out_dims)
        out_specs = tuple(pl.BlockSpec(memory_space=pltpu.MemorySpace.VMEM)
                          for _ in out_dims)

        # VMEM budget from the actual footprint (2x headroom); only override
        # the compiler's scoped limit when we would exceed it.
        in_bytes = sum(a.size * a.dtype.itemsize for a in inputs)
        out_bytes = sum(math.prod(s.shape) * jnp.dtype(s.dtype).itemsize
                        for s in out_shape)
        vmem_need = 2 * (in_bytes + out_bytes)
        compiler_params = None
        if vmem_need > _DEFAULT_SCOPED_VMEM:
            compiler_params = pltpu.CompilerParams(
                vmem_limit_bytes=min(vmem_need, _MAX_VMEM_LIMIT))

        # TODO(synk): for large N, switch to a grid over rows (TILE_N = 128 on
        # v5e, 256-512 on v6e/v7x; N axis "parallel" so v7x's two TensorCores
        # split the batch) with weights resident and a two-pass-per-layer
        # BN-stat/normalize schedule (BN couples rows across every layer).
        # Not needed at these launch-bound shapes.
        kernel = functools.partial(_mlp_fused_kernel, depth=depth, eps=eps,
                                   emit_all=return_intermediates)
        outs = pl.pallas_call(
            kernel,
            out_shape=out_shape,
            in_specs=in_specs,
            out_specs=out_specs,
            compiler_params=compiler_params,
        )(*inputs)

        if return_intermediates:
            outs = list(outs)
            if slice_outputs:
                outs = [o[:, :widths[i + 1]] for i, o in enumerate(outs)]
            return [x] + outs                 # matches MLP.forward's out_list
        out = outs[0]
        return out[:, :widths[-1]] if slice_outputs else out

    return jax.jit(fwd)


def init_mlp_params(key, width_list):
    """Raw parameters matching the PyTorch module (weight stored transposed).

    Linear: W [in, out], b [1, out] ~ U(-1/sqrt(in), 1/sqrt(in)).
    BatchNorm1d: gamma = 1, beta = 0.
    """
    params = []
    depth = len(width_list) - 1
    for i in range(depth):
        d_in, d_out = width_list[i], width_list[i + 1]
        key, kw, kb = jax.random.split(key, 3)
        bound = 1.0 / math.sqrt(d_in)
        w = jax.random.uniform(kw, (d_in, d_out), jnp.float32, -bound, bound)
        b = jax.random.uniform(kb, (1, d_out), jnp.float32, -bound, bound)
        gamma = jnp.ones((1, d_in), jnp.float32)
        beta = jnp.zeros((1, d_in), jnp.float32)
        params.append(dict(w=w, b=b, gamma=gamma, beta=beta))
    return params


def prepare_mlp_params(params, width_list, *, weight_dtype=jnp.bfloat16):
    """One-time padding/packing of parameters for the kernel.

    Pads every feature dim to a multiple of 128 with zeros (lane-dense tiles,
    unmasked vst; zeros propagate exactly since padded gamma/beta/W/b are 0)
    and casts W to `weight_dtype` (bf16 by default) for the MXU.  Call once
    and reuse -- nothing here runs on the per-forward path.
    """
    padded = [_round_up(d, _LANE) for d in width_list]
    flat = []
    for i, p in enumerate(params):
        flat.append(_pad_last(p["gamma"], padded[i]))
        flat.append(_pad_last(p["beta"], padded[i]))
        flat.append(_pad_2d(p["w"], padded[i], padded[i + 1]).astype(weight_dtype))
        flat.append(_pad_last(p["b"], padded[i + 1]))
    return tuple(flat)


def _mlp_reference(params, x, eps=1e-5, matmul_dtype=None):
    """Pure-JAX reference of the PyTorch forward (training-mode BN).

    matmul_dtype=jnp.bfloat16 reproduces the kernel's bf16 MXU operands.
    """
    out_list = [x]
    depth = len(params)
    cur = x
    for i, p in enumerate(params):
        mean = jnp.mean(cur, axis=0, keepdims=True)
        var = jnp.mean((cur - mean) ** 2, axis=0, keepdims=True)
        xn = (cur - mean) / jnp.sqrt(var + eps) * p["gamma"] + p["beta"]
        if matmul_dtype is None:
            y = xn @ p["w"] + p["b"]
        else:
            y = jnp.dot(xn.astype(matmul_dtype), p["w"].astype(matmul_dtype),
                        preferred_element_type=jnp.float32) + p["b"]
        if i < depth - 1:
            y = jnp.maximum(y, 0.0)
        out_list.append(y)
        cur = y
    return out_list


if __name__ == "__main__":
    width_list = [32, 64, 48, 16]   # depth = 3
    batch = 8

    key = jax.random.PRNGKey(0)
    key, kx = jax.random.split(key)
    x = jax.random.normal(kx, (batch, width_list[0]), jnp.float32)

    params = init_mlp_params(key, width_list)
    flat_params = prepare_mlp_params(params, width_list)   # pad + bf16, ONCE

    mlp_forward = make_mlp_forward(width_list)              # jitted wrapper
    outs = mlp_forward(flat_params, x)
    outs = jax.block_until_ready(outs)

    # Shape checks: out_list = [x, h1, h2, out] with true (unpadded) widths.
    assert len(outs) == len(width_list)
    for o, w in zip(outs, width_list):
        assert o.shape == (batch, w), (o.shape, w)

    # Tight check vs a reference using the same bf16 matmul operands.
    refs_matched = _mlp_reference(params, x, matmul_dtype=jnp.bfloat16)
    for o, r in zip(outs, refs_matched):
        assert jnp.allclose(o, r, rtol=1e-2, atol=1e-2), float(
            jnp.max(jnp.abs(o - r)))

    # Looser check vs the full-f32 PyTorch-semantics reference (the bf16 MXU
    # path shifts numerics within bf16 tolerance, per the perf review).
    refs_f32 = _mlp_reference(params, x)
    for o, r in zip(outs, refs_f32):
        assert jnp.allclose(o, r, rtol=5e-2, atol=5e-2), float(
            jnp.max(jnp.abs(o - r)))

    print("KERNEL_OK")
</pallas_src>

<mosaic_0001>
module attributes {stable_mosaic.version = 11 : i64} {
  func.func @_mlp_fused_kernel(%arg0: memref<8x128xf32, #tpu.memory_space<vmem>>, %arg1: memref<1x128xf32, #tpu.memory_space<vmem>>, %arg2: memref<1x128xf32, #tpu.memory_space<vmem>>, %arg3: memref<128x128xbf16, #tpu.memory_space<vmem>>, %arg4: memref<1x128xf32, #tpu.memory_space<vmem>>, %arg5: memref<1x128xf32, #tpu.memory_space<vmem>>, %arg6: memref<1x128xf32, #tpu.memory_space<vmem>>, %arg7: memref<128x128xbf16, #tpu.memory_space<vmem>>, %arg8: memref<1x128xf32, #tpu.memory_space<vmem>>, %arg9: memref<1x128xf32, #tpu.memory_space<vmem>>, %arg10: memref<1x128xf32, #tpu.memory_space<vmem>>, %arg11: memref<128x128xbf16, #tpu.memory_space<vmem>>, %arg12: memref<1x128xf32, #tpu.memory_space<vmem>>, %arg13: memref<8x128xf32, #tpu.memory_space<vmem>>, %arg14: memref<8x128xf32, #tpu.memory_space<vmem>>, %arg15: memref<8x128xf32, #tpu.memory_space<vmem>>) attributes {dimension_semantics = [], scalar_prefetch = 0 : i64, scratch_operands = 0 : i64, tpu.core_type = #tpu.core_type<tc>} {
    %c0 = arith.constant 0 : index
    %c0_0 = arith.constant 0 : index
    %0 = vector.load %arg0[%c0, %c0_0] : memref<8x128xf32, #tpu.memory_space<vmem>>, vector<8x128xf32>
    %cst = arith.constant dense<0.000000e+00> : vector<128xf32>
    %1 = vector.multi_reduction <add>, %0, %cst [0] : vector<8x128xf32> to vector<128xf32>
    %2 = vector.shape_cast %1 : vector<128xf32> to vector<1x128xf32>
    %cst_1 = arith.constant 8.000000e+00 : f32
    %3 = vector.broadcast %cst_1 : f32 to vector<1x128xf32>
    %4 = arith.divf %2, %3 : vector<1x128xf32>
    %5 = arith.mulf %0, %0 : vector<8x128xf32>
    %cst_2 = arith.constant dense<0.000000e+00> : vector<128xf32>
    %6 = vector.multi_reduction <add>, %5, %cst_2 [0] : vector<8x128xf32> to vector<128xf32>
    %7 = vector.shape_cast %6 : vector<128xf32> to vector<1x128xf32>
    %cst_3 = arith.constant 8.000000e+00 : f32
    %8 = vector.broadcast %cst_3 : f32 to vector<1x128xf32>
    %9 = arith.divf %7, %8 : vector<1x128xf32>
    %10 = arith.mulf %4, %4 : vector<1x128xf32>
    %11 = arith.subf %9, %10 : vector<1x128xf32>
    %cst_4 = arith.constant 0.000000e+00 : f32
    %12 = vector.broadcast %cst_4 : f32 to vector<1x128xf32>
    %13 = arith.maximumf %11, %12 : vector<1x128xf32>
    %c0_5 = arith.constant 0 : index
    %c0_6 = arith.constant 0 : index
    %14 = vector.load %arg1[%c0_5, %c0_6] : memref<1x128xf32, #tpu.memory_space<vmem>>, vector<1x128xf32>
    %cst_7 = arith.constant 9.99999974E-6 : f32
    %15 = vector.broadcast %cst_7 : f32 to vector<1x128xf32>
    %16 = arith.addf %13, %15 : vector<1x128xf32>
    %17 = math.rsqrt %16 : vector<1x128xf32>
    %18 = arith.mulf %14, %17 : vector<1x128xf32>
    %c0_8 = arith.constant 0 : index
    %c0_9 = arith.constant 0 : index
    %19 = vector.load %arg2[%c0_8, %c0_9] : memref<1x128xf32, #tpu.memory_space<vmem>>, vector<1x128xf32>
    %20 = arith.mulf %4, %18 : vector<1x128xf32>
    %21 = arith.subf %19, %20 : vector<1x128xf32>
    %22 = vector.broadcast %18 : vector<1x128xf32> to vector<8x128xf32>
    %23 = arith.mulf %0, %22 : vector<8x128xf32>
    %24 = vector.broadcast %21 : vector<1x128xf32> to vector<8x128xf32>
    %25 = arith.addf %23, %24 : vector<8x128xf32>
    %26 = arith.truncf %25 : vector<8x128xf32> to vector<8x128xbf16>
    %c0_10 = arith.constant 0 : index
    %c0_11 = arith.constant 0 : index
    %27 = vector.load %arg3[%c0_10, %c0_11] : memref<128x128xbf16, #tpu.memory_space<vmem>>, vector<128x128xbf16>
    %cst_12 = arith.constant dense<0.000000e+00> : vector<8x128xf32>
    %28 = tpu.matmul %26, %27, %cst_12 {dimension_numbers = #tpu.dot_dimension_numbers<[1], [0], [0], [1], [0, 0, 1, 1], [], []>} : vector<8x128xbf16>, vector<128x128xbf16>, vector<8x128xf32> -> vector<8x128xf32>
    %c0_13 = arith.constant 0 : index
    %c0_14 = arith.constant 0 : index
    %29 = vector.load %arg4[%c0_13, %c0_14] : memref<1x128xf32, #tpu.memory_space<vmem>>, vector<1x128xf32>
    %30 = vector.broadcast %29 : vector<1x128xf32> to vector<8x128xf32>
    %31 = arith.addf %28, %30 : vector<8x128xf32>
    %cst_15 = arith.constant 0.000000e+00 : f32
    %32 = vector.broadcast %cst_15 : f32 to vector<8x128xf32>
    %33 = arith.maximumf %31, %32 : vector<8x128xf32>
    %c0_16 = arith.constant 0 : index
    %c0_17 = arith.constant 0 : index
    %34 = vector.load %arg13[%c0_16, %c0_17] : memref<8x128xf32, #tpu.memory_space<vmem>>, vector<8x128xf32>
    tpu.vector_store %arg13[%c0_16, %c0_17], %33 {strides = array<i32>} : memref<8x128xf32, #tpu.memory_space<vmem>>, vector<8x128xf32>,
    %cst_18 = arith.constant dense<0.000000e+00> : vector<128xf32>
    %35 = vector.multi_reduction <add>, %33, %cst_18 [0] : vector<8x128xf32> to vector<128xf32>
    %36 = vector.shape_cast %35 : vector<128xf32> to vector<1x128xf32>
    %cst_19 = arith.constant 8.000000e+00 : f32
    %37 = vector.broadcast %cst_19 : f32 to vector<1x128xf32>
    %38 = arith.divf %36, %37 : vector<1x128xf32>
    %39 = arith.mulf %33, %33 : vector<8x128xf32>
    %cst_20 = arith.constant dense<0.000000e+00> : vector<128xf32>
    %40 = vector.multi_reduction <add>, %39, %cst_20 [0] : vector<8x128xf32> to vector<128xf32>
    %41 = vector.shape_cast %40 : vector<128xf32> to vector<1x128xf32>
    %cst_21 = arith.constant 8.000000e+00 : f32
    %42 = vector.broadcast %cst_21 : f32 to vector<1x128xf32>
    %43 = arith.divf %41, %42 : vector<1x128xf32>
    %44 = arith.mulf %38, %38 : vector<1x128xf32>
    %45 = arith.subf %43, %44 : vector<1x128xf32>
    %cst_22 = arith.constant 0.000000e+00 : f32
    %46 = vector.broadcast %cst_22 : f32 to vector<1x128xf32>
    %47 = arith.maximumf %45, %46 : vector<1x128xf32>
    %c0_23 = arith.constant 0 : index
    %c0_24 = arith.constant 0 : index
    %48 = vector.load %arg5[%c0_23, %c0_24] : memref<1x128xf32, #tpu.memory_space<vmem>>, vector<1x128xf32>
    %cst_25 = arith.constant 9.99999974E-6 : f32
    %49 = vector.broadcast %cst_25 : f32 to vector<1x128xf32>
    %50 = arith.addf %47, %49 : vector<1x128xf32>
    %51 = math.rsqrt %50 : vector<1x128xf32>
    %52 = arith.mulf %48, %51 : vector<1x128xf32>
    %c0_26 = arith.constant 0 : index
    %c0_27 = arith.constant 0 : index
    %53 = vector.load %arg6[%c0_26, %c0_27] : memref<1x128xf32, #tpu.memory_space<vmem>>, vector<1x128xf32>
    %54 = arith.mulf %38, %52 : vector<1x128xf32>
    %55 = arith.subf %53, %54 : vector<1x128xf32>
    %56 = vector.broadcast %52 : vector<1x128xf32> to vector<8x128xf32>
    %57 = arith.mulf %33, %56 : vector<8x128xf32>
    %58 = vector.broadcast %55 : vector<1x128xf32> to vector<8x128xf32>
    %59 = arith.addf %57, %58 : vector<8x128xf32>
    %60 = arith.truncf %59 : vector<8x128xf32> to vector<8x128xbf16>
    %c0_28 = arith.constant 0 : index
    %c0_29 = arith.constant 0 : index
    %61 = vector.load %arg7[%c0_28, %c0_29] : memref<128x128xbf16, #tpu.memory_space<vmem>>, vector<128x128xbf16>
    %cst_30 = arith.constant dense<0.000000e+00> : vector<8x128xf32>
    %62 = tpu.matmul %60, %61, %cst_30 {dimension_numbers = #tpu.dot_dimension_numbers<[1], [0], [0], [1], [0, 0, 1, 1], [], []>} : vector<8x128xbf16>, vector<128x128xbf16>, vector<8x128xf32> -> vector<8x128xf32>
    %c0_31 = arith.constant 0 : index
    %c0_32 = arith.constant 0 : index
    %63 = vector.load %arg8[%c0_31, %c0_32] : memref<1x128xf32, #tpu.memory_space<vmem>>, vector<1x128xf32>
    %64 = vector.broadcast %63 : vector<1x128xf32> to vector<8x128xf32>
    %65 = arith.addf %62, %64 : vector<8x128xf32>
    %cst_33 = arith.constant 0.000000e+00 : f32
    %66 = vector.broadcast %cst_33 : f32 to vector<8x128xf32>
    %67 = arith.maximumf %65, %66 : vector<8x128xf32>
    %c0_34 = arith.constant 0 : index
    %c0_35 = arith.constant 0 : index
    %68 = vector.load %arg14[%c0_34, %c0_35] : memref<8x128xf32, #tpu.memory_space<vmem>>, vector<8x128xf32>
    tpu.vector_store %arg14[%c0_34, %c0_35], %67 {strides = array<i32>} : memref<8x128xf32, #tpu.memory_space<vmem>>, vector<8x128xf32>,
    %cst_36 = arith.constant dense<0.000000e+00> : vector<128xf32>
    %69 = vector.multi_reduction <add>, %67, %cst_36 [0] : vector<8x128xf32> to vector<128xf32>
    %70 = vector.shape_cast %69 : vector<128xf32> to vector<1x128xf32>
    %cst_37 = arith.constant 8.000000e+00 : f32
    %71 = vector.broadcast %cst_37 : f32 to vector<1x128xf32>
    %72 = arith.divf %70, %71 : vector<1x128xf32>
    %73 = arith.mulf %67, %67 : vector<8x128xf32>
    %cst_38 = arith.constant dense<0.000000e+00> : vector<128xf32>
    %74 = vector.multi_reduction <add>, %73, %cst_38 [0] : vector<8x128xf32> to vector<128xf32>
    %75 = vector.shape_cast %74 : vector<128xf32> to vector<1x128xf32>
    %cst_39 = arith.constant 8.000000e+00 : f32
    %76 = vector.broadcast %cst_39 : f32 to vector<1x128xf32>
    %77 = arith.divf %75, %76 : vector<1x128xf32>
    %78 = arith.mulf %72, %72 : vector<1x128xf32>
    %79 = arith.subf %77, %78 : vector<1x128xf32>
    %cst_40 = arith.constant 0.000000e+00 : f32
    %80 = vector.broadcast %cst_40 : f32 to vector<1x128xf32>
    %81 = arith.maximumf %79, %80 : vector<1x128xf32>
    %c0_41 = arith.constant 0 : index
    %c0_42 = arith.constant 0 : index
    %82 = vector.load %arg9[%c0_41, %c0_42] : memref<1x128xf32, #tpu.memory_space<vmem>>, vector<1x128xf32>
    %cst_43 = arith.constant 9.99999974E-6 : f32
    %83 = vector.broadcast %cst_43 : f32 to vector<1x128xf32>
    %84 = arith.addf %81, %83 : vector<1x128xf32>
    %85 = math.rsqrt %84 : vector<1x128xf32>
    %86 = arith.mulf %82, %85 : vector<1x128xf32>
    %c0_44 = arith.constant 0 : index
    %c0_45 = arith.constant 0 : index
    %87 = vector.load %arg10[%c0_44, %c0_45] : memref<1x128xf32, #tpu.memory_space<vmem>>, vector<1x128xf32>
    %88 = arith.mulf %72, %86 : vector<1x128xf32>
    %89 = arith.subf %87, %88 : vector<1x128xf32>
    %90 = vector.broadcast %86 : vector<1x128xf32> to vector<8x128xf32>
    %91 = arith.mulf %67, %90 : vector<8x128xf32>
    %92 = vector.broadcast %89 : vector<1x128xf32> to vector<8x128xf32>
    %93 = arith.addf %91, %92 : vector<8x128xf32>
    %94 = arith.truncf %93 : vector<8x128xf32> to vector<8x128xbf16>
    %c0_46 = arith.constant 0 : index
    %c0_47 = arith.constant 0 : index
    %95 = vector.load %arg11[%c0_46, %c0_47] : memref<128x128xbf16, #tpu.memory_space<vmem>>, vector<128x128xbf16>
    %cst_48 = arith.constant dense<0.000000e+00> : vector<8x128xf32>
    %96 = tpu.matmul %94, %95, %cst_48 {dimension_numbers = #tpu.dot_dimension_numbers<[1], [0], [0], [1], [0, 0, 1, 1], [], []>} : vector<8x128xbf16>, vector<128x128xbf16>, vector<8x128xf32> -> vector<8x128xf32>
    %c0_49 = arith.constant 0 : index
    %c0_50 = arith.constant 0 : index
    %97 = vector.load %arg12[%c0_49, %c0_50] : memref<1x128xf32, #tpu.memory_space<vmem>>, vector<1x128xf32>
    %98 = vector.broadcast %97 : vector<1x128xf32> to vector<8x128xf32>
    %99 = arith.addf %96, %98 : vector<8x128xf32>
    %c0_51 = arith.constant 0 : index
    %c0_52 = arith.constant 0 : index
    %100 = vector.load %arg15[%c0_51, %c0_52] : memref<8x128xf32, #tpu.memory_space<vmem>>, vector<8x128xf32>
    tpu.vector_store %arg15[%c0_51, %c0_52], %99 {strides = array<i32>} : memref<8x128xf32, #tpu.memory_space<vmem>>, vector<8x128xf32>,
    return
  }
}

</mosaic_0001>

<bundles_post_ra>
// kernel: fwd.1
= control target key start
LH: loop header
LB: loop body
LE: loop exit
PB: predicated region body
PF: predicated region fallthrough
CT: control target
= control target key end

     0   :  { %21 = vsyncpa [#allocation3], 0  ;;  %s1052_s0 = inlined_call_operand.vmem [shape: f32[8,128], index: 0, kind: input, shape index: {}]   ;;  %s1053_s1 = inlined_call_operand.vmem [shape: f32[1,128], index: 1, kind: input, shape index: {}]   ;;  %s1054_s2 = inlined_call_operand.vmem [shape: f32[1,128], index: 2, kind: input, shape index: {}]   ;;  %s1055_s3 = inlined_call_operand.hbm [shape: bf16[128,128], index: 3, kind: input, shape index: {}]   ;;  %s1056_s4 = inlined_call_operand.vmem [shape: f32[1,128], index: 4, kind: input, shape index: {}]   ;;  %s1057_s5 = inlined_call_operand.vmem [shape: f32[1,128], index: 5, kind: input, shape index: {}]   ;;  %s1058_s6 = inlined_call_operand.vmem [shape: f32[1,128], index: 6, kind: input, shape index: {}]   ;;  %s1059_s7 = inlined_call_operand.hbm [shape: bf16[128,128], index: 7, kind: input, shape index: {}]   ;;  %s1060_s8 = inlined_call_operand.vmem [shape: f32[1,128], index: 8, kind: input, shape index: {}]   ;;  %s1061_s9 = inlined_call_operand.vmem [shape: f32[1,128], index: 9, kind: input, shape index: {}]   ;;  %s1062_s10 = inlined_call_operand.vmem [shape: f32[1,128], index: 10, kind: input, shape index: {}]   ;;  %s1063_s11 = inlined_call_operand.hbm [shape: bf16[128,128], index: 11, kind: input, shape index: {}]   ;;  %s1064_s12 = inlined_call_operand.vmem [shape: f32[1,128], index: 12, kind: input, shape index: {}]   ;;  %s1065_s13 = inlined_call_operand.hbm [shape: f32[8,128], index: 13, kind: output, shape index: {0}]   ;;  %s1066_s14 = inlined_call_operand.hbm [shape: f32[8,128], index: 14, kind: output, shape index: {1}]   ;;  %s1067_s15 = inlined_call_operand.hbm [shape: f32[8,128], index: 15, kind: output, shape index: {2}]  }
   0x1   :  { %22 = vsyncpa [#allocation6], 0 }
   0x2   :  { %23 = vsyncpa [#allocation4], 0 }
   0x3   :  { %24 = vsyncpa [#allocation10], 0  ;;  %s876_s18 = smov [#allocation5]   ;;  %s877_s20 = smov [#allocation2]  }
   0x4   :  { %s54_s19 = sshll.u32 %s876_s18, 4  ;;  %s36_s21 = sshll.u32 %s877_s20, 4  ;;  %s55_s19 = int_to_ptr.vmem [resolvable:$true] %s54_s19  ;;  %s37_s21 = int_to_ptr.vmem [resolvable:$true] %s36_s21 }
   0x5   :  { %s756_s22 = scalar_lea.vmem %s55_s19, 1024  ;;  %p761_p1 = scmp.lt.s32.totalorder %s55_s19, %s55_s19 }
   0x6   :  { %p757_p0 = scmp.ne.s32.totalorder %s55_s19, %s756_s22  ;;  %p762_p2 = scmp.lt.s32.totalorder %s756_s22, %s756_s22 }
   0x8   :  { %p763_p3 = por %p762_p2, %p761_p1 }
   0xa   :  { %p764_p4 = pnand %p763_p3, %p757_p0 }
   0xc   :  { %767 = shalt.err (!%p764_p4)
}
   0xd   :  { %s878_s23 = smov 64   ;;  %s879_s24 = smov 4  }
   0xe   :  { %60 = dma.hbm_to_vmem [thread:$0]  %s1059_s7, 1024, %s55_s19, [#allocation6], %s878_s23, %s878_s23, %s879_s24  }
   0xf   :  { %s776_s27 = scalar_lea.vmem %s37_s21, 1024  ;;  %p781_p6 = scmp.lt.s32.totalorder %s37_s21, %s37_s21 }
  0x10   :  { %p777_p5 = scmp.ne.s32.totalorder %s37_s21, %s776_s27  ;;  %p782_p7 = scmp.lt.s32.totalorder %s776_s27, %s776_s27 }
  0x12   :  { %p783_p8 = por %p782_p7, %p781_p6 }
  0x14   :  { %p784_p9 = pnand %p783_p8, %p777_p5 }
  0x16   :  { %787 = shalt.err (!%p784_p9)
}
  0x17   :  { %42 = dma.hbm_to_vmem [thread:$0]  %s1055_s3, 1024, %s37_s21, [#allocation3], %s878_s23, %s878_s23, %s879_s24  }
  0x18   :  { %s880_s30 = smov [#allocation7]  }
  0x19   :  { %s72_s16 = sshll.u32 %s880_s30, 4  ;;  %s73_s16 = int_to_ptr.vmem [resolvable:$true] %s72_s16 }
  0x1a   :  { %s796_s17 = scalar_lea.vmem %s73_s16, 1024  ;;  %p801_p11 = scmp.lt.s32.totalorder %s73_s16, %s73_s16 }
  0x1b   :  { %p797_p10 = scmp.ne.s32.totalorder %s73_s16, %s796_s17  ;;  %p802_p12 = scmp.lt.s32.totalorder %s796_s17, %s796_s17 }
  0x1d   :  { %p803_p13 = por %p802_p12, %p801_p11 }
  0x1f   :  { %p804_p0 = pnand %p803_p13, %p797_p10 }
  0x21   :  { %807 = shalt.err (!%p804_p0)
}
  0x22   :  { %78 = dma.hbm_to_vmem [thread:$0]  %s1063_s11, 1024, %s73_s16, [#allocation6], %s878_s23, %s878_s23, %s879_s24  }
  0x23   :  { %868 = dma.done.wait [#allocation3], 1024  }
  0x24   :  { %869 = vsyncadd [#allocation3], 4294966272 }
  0x25   :  { %870 = dma.done.wait [#allocation6], 2048  }
  0x26   :  { %871 = vsyncadd [#allocation6], 4294965248  ;;  %v881_v0 = vmov 0.0   ;;  %vm882_vm0 = vmmov 0   ;;  %v718_v1 = vld [vmem:[#allocation2 + $0x38] sm:$0xff]   ;;  %v719_v2 = vld [vmem:[#allocation2 + $0x30] sm:$0xff]   ;;  %v119_v29 = vlaneseq }
  0x27   :  { %648 = vmatprep.subr.bf16.mxu0 %v881_v0  ;;  %664 = vmatprep.mubr.msk.bf16.mxu0 %vm882_vm0, %v881_v0  ;;  %v720_v3 = vld [vmem:[#allocation2 + $0x28] sm:$0xff]   ;;  %v91_v4 = vld [vmem:[%s1052_s0] sm:$0xff]  ;;  %v722_v10 = vld [vmem:[#allocation2 + $0x18] sm:$0xff]   ;;  %s883_s28 = smov [#allocation9]  }
  0x28   :  { %668 = vmatprep.subr.bf16.mxu1 %v881_v0  ;;  %684 = vmatprep.mubr.msk.bf16.mxu1 %vm882_vm0, %v881_v0  ;;  %v721_v5 = vld [vmem:[#allocation2 + $0x20] sm:$0xff]   ;;  %v92_v6 = vrot.slane %v91_v4, 4  ;;  %v100_v7 = vmul.f32 %v91_v4, %v91_v4  ;;  %v723_v15 = vld [vmem:[#allocation2 + $0x10] sm:$0xff]   ;;  %v724_v22 = vld [vmem:[#allocation2 + $0x8] sm:$0xff]   ;;  %v120_v30 = vshrl.u32 %v119_v29, 7  ;;  %s567_s29 = sshll.u32 %s883_s28, 4  ;;  %s568_s29 = int_to_ptr.vmem [resolvable:$true] %s567_s29 }
  0x29   :  { %649 = vmatpush3.bf16.msra.mxu0 %v718_v1  ;;  %v725_v26 = vld [vmem:[#allocation2] sm:$0xff]   ;;  %v726_v43 = vld [vmem:[#allocation5 + $0x38] sm:$0xff]   ;;  %v727_v44 = vld [vmem:[#allocation5 + $0x30] sm:$0xff]   ;;  %s808_s16 = scalar_lea.vmem %s568_s29, 128  ;;  %p813_p2 = scmp.lt.s32.totalorder %s568_s29, %s568_s29 }
  0x2a   :  { %650 = vmatprep.subr.bf16.mxu0 %v881_v0  ;;  %v93_v8 = vadd.f32 %v92_v6, %v91_v4  ;;  %v101_v9 = vrot.slane %v100_v7, 4  ;;  %v111_v31 = vld [vmem:[%s1053_s1] sm:$0x1]  ;;  %v995_v32 = vsub.s32 0, %v120_v30  ;;  %669 = vmatpush3.bf16.msra.mxu1 %v726_v43  ;;  %v728_v45 = vld [vmem:[#allocation5 + $0x28] sm:$0xff]   ;;  %v730_v47 = vld [vmem:[#allocation5 + $0x18] sm:$0xff]   ;;  %p809_p1 = scmp.ne.s32.totalorder %s568_s29, %s808_s16  ;;  %p814_p3 = scmp.lt.s32.totalorder %s808_s16, %s808_s16 }
  0x2b   :  { %v115_v35 = vld [vmem:[%s1054_s2] sm:$0x1]  ;;  %670 = vmatprep.subr.bf16.mxu1 %v881_v0  ;;  %v731_v48 = vld [vmem:[#allocation5 + $0x10] sm:$0xff]   ;;  %v732_v49 = vld [vmem:[#allocation5 + $0x8] sm:$0xff]  }
  0x2c   :  { %v94_v11 = vrot.slane %v93_v8, 2  ;;  %v102_v12 = vadd.f32 %v101_v9, %v100_v7  ;;  %v729_v46 = vld [vmem:[#allocation5 + $0x20] sm:$0xff]   ;;  %v738_v29 = vld [vmem:[#allocation7 + $0x18] sm:$0xff]   ;;  %v739_v30 = vld [vmem:[#allocation7 + $0x10] sm:$0xff]   ;;  %p815_p4 = por %p814_p3, %p813_p2 }
  0x2d   :  { %651 = vmatpush3.bf16.msra.mxu0 %v719_v2  ;;  %v733_v50 = vld [vmem:[#allocation5] sm:$0xff]  }
  0x2e   :  { %652 = vmatprep.subr.bf16.mxu0 %v881_v0  ;;  %v95_v13 = vadd.f32 %v94_v11, %v93_v8  ;;  %v103_v14 = vrot.slane %v102_v12, 2  ;;  %671 = vmatpush3.bf16.msra.mxu1 %v727_v44  ;;  %v594_v51 = vld [vmem:[%s1056_s4] ss:$0 sm:$0xff]  ;;  %p816_p5 = pnand %p815_p4, %p809_p1 }
  0x2f   :  { %672 = vmatprep.subr.bf16.mxu1 %v881_v0 }
  0x30   :  { %v96_v16 = vrot.slane %v95_v13, 1  ;;  %v104_v17 = vadd.f32 %v103_v14, %v102_v12  ;;  %v264_v14 = vld [vmem:[%s1057_s5] sm:$0x1] }
  0x31   :  { %653 = vmatpush3.bf16.msra.mxu0 %v720_v3 }
  0x32   :  { %654 = vmatprep.subr.bf16.mxu0 %v881_v0  ;;  %v97_v18 = vadd.f32 %v96_v16, %v95_v13  ;;  %v105_v19 = vrot.slane %v104_v17, 1  ;;  %673 = vmatpush3.bf16.msra.mxu1 %v728_v45 }
  0x33   :  { %674 = vmatprep.subr.bf16.mxu1 %v881_v0 }
  0x34   :  { %v99_v20 = vmul.f32 0.125, %v97_v18  ;;  %v106_v21 = vadd.f32 %v105_v19, %v104_v17  ;;  %v268_v17 = vld [vmem:[%s1058_s6] sm:$0x1] }
  0x35   :  { %655 = vmatpush3.bf16.msra.mxu0 %v721_v5 }
  0x36   :  { %656 = vmatprep.subr.bf16.mxu0 %v881_v0  ;;  %v107_v23 = vmul.f32 0.125, %v106_v21  ;;  %v108_v24 = vmul.f32 %v99_v20, %v99_v20  ;;  %675 = vmatpush3.bf16.msra.mxu1 %v729_v46 }
  0x37   :  { %676 = vmatprep.subr.bf16.mxu1 %v881_v0 }
  0x38   :  { %v109_v25 = vsub.f32 %v107_v23, %v108_v24 }
  0x39   :  { %657 = vmatpush3.bf16.msra.mxu0 %v722_v10 }
  0x3a   :  { %658 = vmatprep.subr.bf16.mxu0 %v881_v0  ;;  %v110_v27 = vmax.f32 %v109_v25, 0.0  ;;  %677 = vmatpush3.bf16.msra.mxu1 %v730_v47  ;;  %v734_v25 = vld [vmem:[#allocation7 + $0x38] sm:$0xff]  }
  0x3b   :  { %678 = vmatprep.subr.bf16.mxu1 %v881_v0 }
  0x3c   :  { %v112_v28 = vadd.f32 1e-05, %v110_v27  ;;  %v736_v27 = vld [vmem:[#allocation7 + $0x28] sm:$0xff]  }
  0x3d   :  { %659 = vmatpush3.bf16.msra.mxu0 %v723_v15 }
  0x3e   :  { %660 = vmatprep.subr.bf16.mxu0 %v881_v0  ;;  %742 = vrsqrt.f32 %v112_v28  ;;  %679 = vmatpush3.bf16.msra.mxu1 %v731_v48  ;;  %v737_v28 = vld [vmem:[#allocation7 + $0x20] sm:$0xff]  }
  0x3f   :  { %680 = vmatprep.subr.bf16.mxu1 %v881_v0 }
  0x41   :  { %661 = vmatpush3.bf16.msra.mxu0 %v724_v22 }
  0x42   :  { %662 = vmatprep.subr.bf16.mxu0 %v881_v0  ;;  %681 = vmatpush3.bf16.msra.mxu1 %v732_v49 }
  0x43   :  { %682 = vmatprep.subr.bf16.mxu1 %v881_v0 }
  0x45   :  { %663 = vmatpush3.bf16.msra.mxu0 %v725_v26  ;;  %v735_v26 = vld [vmem:[#allocation7 + $0x30] sm:$0xff]  }
  0x46   :  { %688 = vmatprep.subr.bf16.mxu0 %v881_v0  ;;  %683 = vmatpush3.bf16.msra.mxu1 %v733_v50 }
  0x4b   :  { %v743_v33 = vpop.eup %742 }
  0x4c   :  { %v114_v34 = vmul.f32 %v743_v33, %v111_v31  ;;  %v740_v31 = vld [vmem:[#allocation7 + $0x8] sm:$0xff]   ;;  %v741_v33 = vld [vmem:[#allocation7] sm:$0xff]  }
  0x4e   :  { %v116_v36 = vmul.f32 %v114_v34, %v99_v20  ;;  %v122_v37 = vrot.slane %v114_v34, %v995_v32  ;;  %v603_v34 = vld [vmem:[%s1060_s8] ss:$0 sm:$0xff] }
  0x50   :  { %v117_v38 = vsub.f32 %v115_v35, %v116_v36  ;;  %v124_v39 = vmul.f32 %v122_v37, %v91_v4 }
  0x52   :  { %v129_v40 = vrot.slane %v117_v38, %v995_v32 }
  0x54   :  { %v131_v41 = vadd.f32 %v129_v40, %v124_v39 }
  0x56   :  { %v132_v42 = vpack.c.bf16 %v131_v41, %v131_v41 }
  0x58   :  { %665 = vmatmul.mubr.bf16.vlgmr.msra.gmra.mxu0 %v132_v42 }
  0x59   :  { %704 = vmatprep.mubr.msk.bf16.mxu0 %vm882_vm0, %v881_v0  ;;  %689 = vmatpush3.bf16.msra.mxu0 %v734_v25 }
  0x5a   :  { %690 = vmatprep.subr.bf16.mxu0 %v881_v0 }
  0x5d   :  { %691 = vmatpush3.bf16.msra.mxu0 %v735_v26 }
  0x5e   :  { %692 = vmatprep.subr.bf16.mxu0 %v881_v0 }
  0x61   :  { %693 = vmatpush3.bf16.msra.mxu0 %v736_v27 }
  0x62   :  { %694 = vmatprep.subr.bf16.mxu0 %v881_v0 }
  0x65   :  { %695 = vmatpush3.bf16.msra.mxu0 %v737_v28 }
  0x66   :  { %696 = vmatprep.subr.bf16.mxu0 %v881_v0 }
  0x69   :  { %697 = vmatpush3.bf16.msra.mxu0 %v738_v29 }
  0x6a   :  { %698 = vmatprep.subr.bf16.mxu0 %v881_v0 }
  0x6d   :  { %699 = vmatpush3.bf16.msra.mxu0 %v739_v30 }
  0x6e   :  { %700 = vmatprep.subr.bf16.mxu0 %v881_v0 }
  0x71   :  { %701 = vmatpush3.bf16.msra.mxu0 %v740_v31 }
  0x72   :  { %702 = vmatprep.subr.bf16.mxu0 %v881_v0 }
  0x75   :  { %703 = vmatpush3.bf16.msra.mxu0 %v741_v33 }
 0x118   :  { %v238_v52 = vpop.f32.mrf.mxu0 }
 0x119   :  { %v239_v53 = vadd.f32 %v594_v51, %v238_v52 }
 0x11a   :  { %v666_v54 = vpop.f32.mrf.mxu0 }
 0x11b   :  { %v244_v55 = vmax.f32 %v239_v53, 0.0 }
 0x11c   :  { %v241_v56 = vpop.f32.mrf.mxu0 }
 0x11d   :  { %v246_v57 = vrot.slane %v244_v55, 4  ;;  %v253_v58 = vmul.f32 %v244_v55, %v244_v55  ;;  %245 = vst [vmem:[#allocation8] sm:$0xff] %v244_v55 }
 0x11e   :  { %v667_v59 = vpop.f32.mrf.mxu0 }
 0x11f   :  { %v247_v60 = vadd.f32 %v246_v57, %v244_v55  ;;  %v254_v61 = vrot.slane %v253_v58, 4  ;;  %v417_v59 = vld [vmem:[%s1061_s9] sm:$0x1]  ;;  %s884_s9 = smov [#allocation8]  }
 0x120   :  { %s557_s30 = sshll.u32 %s884_s9, 4  ;;  %s558_s30 = int_to_ptr.vmem [resolvable:$true] %s557_s30 }
 0x121   :  { %v248_v62 = vrot.slane %v247_v60, 2  ;;  %v255_v63 = vadd.f32 %v254_v61, %v253_v58 }
 0x123   :  { %v256_v1 = vrot.slane %v255_v63, 2  ;;  %v249_v2 = vadd.f32 %v248_v62, %v247_v60  ;;  %v421_v62 = vld [vmem:[%s1062_s10] sm:$0x1] }
 0x125   :  { %v257_v3 = vadd.f32 %v256_v1, %v255_v63  ;;  %v250_v4 = vrot.slane %v249_v2, 1 }
 0x127   :  { %v258_v5 = vrot.slane %v257_v3, 1  ;;  %v251_v6 = vadd.f32 %v250_v4, %v249_v2 }
 0x129   :  { %v252_v7 = vmul.f32 0.125, %v251_v6  ;;  %v259_v8 = vadd.f32 %v258_v5, %v257_v3 }
 0x12b   :  { %v260_v9 = vmul.f32 0.125, %v259_v8  ;;  %v261_v10 = vmul.f32 %v252_v7, %v252_v7 }
 0x12d   :  { %v262_v11 = vsub.f32 %v260_v9, %v261_v10 }
 0x12f   :  { %v263_v12 = vmax.f32 %v262_v11, 0.0 }
 0x131   :  { %v265_v13 = vadd.f32 1e-05, %v263_v12 }
 0x133   :  { %744 = vrsqrt.f32 %v265_v13 }
 0x140   :  { %v745_v15 = vpop.eup %744 }
 0x141   :  { %v267_v16 = vmul.f32 %v745_v15, %v264_v14 }
 0x143   :  { %v269_v18 = vmul.f32 %v267_v16, %v252_v7  ;;  %v275_v19 = vrot.slane %v267_v16, %v995_v32 }
 0x145   :  { %v270_v20 = vsub.f32 %v268_v17, %v269_v18  ;;  %v277_v21 = vmul.f32 %v275_v19, %v244_v55 }
 0x147   :  { %v282_v22 = vrot.slane %v270_v20, %v995_v32 }
 0x149   :  { %v284_v23 = vadd.f32 %v282_v22, %v277_v21 }
 0x14b   :  { %v285_v24 = vpack.c.bf16 %v284_v23, %v284_v23 }
 0x14d   :  { %685 = vmatmul.mubr.bf16.vlgmr.msra.gmra.mxu1 %v285_v24 }
 0x20d   :  { %v391_v35 = vpop.f32.mrf.mxu1 }
 0x20e   :  { %v392_v36 = vadd.f32 %v603_v34, %v391_v35 }
 0x20f   :  { %v686_v37 = vpop.f32.mrf.mxu1 }
 0x210   :  { %v397_v38 = vmax.f32 %v392_v36, 0.0 }
 0x211   :  { %v394_v39 = vpop.f32.mrf.mxu1 }
 0x212   :  { %v399_v40 = vrot.slane %v397_v38, 4  ;;  %v406_v41 = vmul.f32 %v397_v38, %v397_v38  ;;  %398 = vst [vmem:[#allocation9] sm:$0xff] %v397_v38 }
 0x213   :  { %v687_v42 = vpop.f32.mrf.mxu1 }
 0x214   :  { %v400_v43 = vadd.f32 %v399_v40, %v397_v38  ;;  %v407_v44 = vrot.slane %v406_v41, 4 }
 0x216   :  { %v401_v45 = vrot.slane %v400_v43, 2  ;;  %v408_v46 = vadd.f32 %v407_v44, %v406_v41 }
 0x218   :  { %v402_v47 = vadd.f32 %v401_v45, %v400_v43  ;;  %v409_v0 = vrot.slane %v408_v46, 2 }
 0x21a   :  { %v403_v48 = vrot.slane %v402_v47, 1  ;;  %v410_v49 = vadd.f32 %v409_v0, %v408_v46 }
 0x21c   :  { %v411_v50 = vrot.slane %v410_v49, 1  ;;  %v404_v51 = vadd.f32 %v403_v48, %v402_v47 }
 0x21e   :  { %v412_v52 = vadd.f32 %v411_v50, %v410_v49  ;;  %v405_v53 = vmul.f32 0.125, %v404_v51 }
 0x220   :  { %v413_v54 = vmul.f32 0.125, %v412_v52  ;;  %v414_v55 = vmul.f32 %v405_v53, %v405_v53 }
 0x222   :  { %v415_v56 = vsub.f32 %v413_v54, %v414_v55 }
 0x224   :  { %v416_v57 = vmax.f32 %v415_v56, 0.0 }
 0x226   :  { %v418_v58 = vadd.f32 1e-05, %v416_v57 }
 0x228   :  { %746 = vrsqrt.f32 %v418_v58 }
 0x235   :  { %v747_v60 = vpop.eup %746 }
 0x236   :  { %v420_v61 = vmul.f32 %v747_v60, %v417_v59 }
 0x238   :  { %v422_v63 = vmul.f32 %v420_v61, %v405_v53  ;;  %v428_v1 = vrot.slane %v420_v61, %v995_v32 }
 0x23a   :  { %v423_v2 = vsub.f32 %v421_v62, %v422_v63  ;;  %v430_v3 = vmul.f32 %v428_v1, %v397_v38 }
 0x23c   :  { %v435_v4 = vrot.slane %v423_v2, %v995_v32 }
 0x23e   :  { %v437_v5 = vadd.f32 %v435_v4, %v430_v3 }
 0x240   :  { %v438_v6 = vpack.c.bf16 %v437_v5, %v437_v5 }
 0x242   :  { %705 = vmatmul.mubr.bf16.vlgmr.msra.gmra.mxu0 %v438_v6 }
 0x243   :  { %819 = shalt.err (!%p816_p5)
}
 0x244   :  { %570 = dma.vmem_to_hbm [thread:$0]  %s568_s29, 128, %s1066_s14, [#allocation10]  }
 0x245   :  { %s828_s7 = scalar_lea.vmem %s558_s30, 128  ;;  %p833_p7 = scmp.lt.s32.totalorder %s558_s30, %s558_s30 }
 0x246   :  { %p829_p6 = scmp.ne.s32.totalorder %s558_s30, %s828_s7  ;;  %p834_p8 = scmp.lt.s32.totalorder %s828_s7, %s828_s7 }
 0x248   :  { %p835_p9 = por %p834_p8, %p833_p7 }
 0x24a   :  { %p836_p10 = pnand %p835_p9, %p829_p6 }
 0x24c   :  { %839 = shalt.err (!%p836_p10)
}
 0x24d   :  { %560 = dma.vmem_to_hbm [thread:$0]  %s558_s30, 128, %s1065_s13, [#allocation4]   ;;  %v612_v32 = vld [vmem:[%s1064_s12] ss:$0 sm:$0xff] }
 0x24e   :  { %s885_s19 = smov [#allocation11]  }
 0x24f   :  { %s577_s20 = sshll.u32 %s885_s19, 4  ;;  %s578_s20 = int_to_ptr.vmem [resolvable:$true] %s577_s20 }
 0x250   :  { %s848_s14 = scalar_lea.vmem %s578_s20, 128  ;;  %p853_p12 = scmp.lt.s32.totalorder %s578_s20, %s578_s20 }
 0x251   :  { %p849_p11 = scmp.ne.s32.totalorder %s578_s20, %s848_s14  ;;  %p854_p13 = scmp.lt.s32.totalorder %s848_s14, %s848_s14 }
 0x253   :  { %p855_p0 = por %p854_p13, %p853_p12 }
 0x255   :  { %p856_p1 = pnand %p855_p0, %p849_p11 }
 0x302   :  { %v544_v7 = vpop.f32.mrf.mxu0 }
 0x303   :  { %v545_v8 = vadd.f32 %v612_v32, %v544_v7 }
 0x304   :  { %v706_v9 = vpop.f32.mrf.mxu0 }
 0x305   :  { %550 = vst [vmem:[#allocation11] sm:$0xff] %v545_v8 }
 0x306   :  { %v547_v10 = vpop.f32.mrf.mxu0 }
 0x307   :  { %859 = shalt.err (!%p856_p1)
}
 0x308   :  { %580 = dma.vmem_to_hbm [thread:$0]  %s578_s20, 128, %s1067_s15, [#allocation10]   ;;  %v707_v11 = vpop.f32.mrf.mxu0 }
 0x309   :  { %872 = dma.done.wait [#allocation4], 128  }
 0x30a   :  { %873 = vsyncadd [#allocation4], 4294967168 }
 0x30b   :  { %874 = dma.done.wait [#allocation10], 256  }
 0x30c   :  { %875 = vsyncadd [#allocation10], 4294967040 }
 0x30d   :  { %590 = vsyncpa [#allocation3], 1 }
 0x30e   :  { %591 = vsyncpa [#allocation6], 1 }
 0x30f   :  { %592 = vsyncpa [#allocation4], 1 }
 0x310   :  { %593 = vsyncpa [#allocation10], 1 }

</bundles_post_ra>
